<compile_context>
chip_gen: v5e
topology: v5e:2x2
jax: 0.10.0
libtpu: 0.0.40
codegen_flags: <defaults>
</compile_context>

<pallas_src>
import math
from functools import partial

import jax
import jax.numpy as jnp
from jax import lax
from jax.experimental import pallas as pl
from jax.experimental.pallas import tpu as pltpu


def _vmem_spec():
    return pl.BlockSpec(memory_space=pltpu.MemorySpace.VMEM)


def _smem_spec():
    return pl.BlockSpec(memory_space=pltpu.MemorySpace.SMEM)


def _round_up(x, m):
    return ((x + m - 1) // m) * m


# ----------------------------------------------------------------------------
# In-kernel helper: attribute propagation (get_new_attribute).  Kept in f32.
# ----------------------------------------------------------------------------
def _attribute_propagation(attrs, att_g, thresh, temperature):
    g = jnp.dot(attrs, att_g, preferred_element_type=jnp.float32)         # (C, Ha)
    # eps inside the rsqrt: mirrors the eps-clamped norms of F.cosine_similarity
    gn = g * lax.rsqrt(jnp.sum(g * g, axis=-1, keepdims=True) + 1e-12)
    sims = lax.dot_general(gn, gn, (((1,), (1,)), ((), ())),
                           preferred_element_type=jnp.float32)            # (C, C)
    raw = jnp.where(sims > thresh, sims, jnp.full_like(sims, -9.0e15)) * temperature
    m = jnp.max(raw, axis=1, keepdims=True)
    e = jnp.exp(raw - m)
    attn = e / jnp.sum(e, axis=1, keepdims=True)    # exact reciprocal (tiny, one-shot)
    return jnp.dot(attn, attrs, preferred_element_type=jnp.float32)       # (C, D)


# ----------------------------------------------------------------------------
# Fused single-shot kernel (tiny shapes only): attention + relation head.
# ----------------------------------------------------------------------------
def _fused_kernel(attrs_ref, att_g_ref, img_ref, img_w_ref, sem_w_t_ref, sem_b_ref,
                  fc_w_ref, fc_b_ref, out_ref, att_outs_ref,
                  *, thresh, temperature, mxu_dtype):
    att_outs = _attribute_propagation(attrs_ref[...], att_g_ref[...],
                                      thresh, temperature)                # (C, D)
    att_outs_ref[...] = att_outs

    img_proj = jnp.dot(img_ref[...], img_w_ref[...],
                       preferred_element_type=jnp.float32)                # (B, H)
    # sem_w passed transposed (H, D); contract both last dims (NT) -> (C, H)
    sem_proj = lax.dot_general(att_outs.astype(mxu_dtype), sem_w_t_ref[...],
                               (((1,), (1,)), ((), ())),
                               preferred_element_type=jnp.float32) + sem_b_ref[...]

    hidden = jnp.maximum(img_proj[:, None, :] + sem_proj[None, :, :], 0.0)   # (B, C, H)
    fc_w = fc_w_ref[...]                                                     # (1, H)
    out_ref[...] = jnp.sum(hidden * fc_w[None, :, :], axis=-1) + fc_b_ref[0, 0]


# ----------------------------------------------------------------------------
# Tiled path, stage 1: hoist att_outs / img_proj / sem_proj^T once.
# Padded outputs are written directly (no wrapper-side jnp.pad round-trip);
# sem_proj is produced already transposed via an NT dot_general.
# ----------------------------------------------------------------------------
def _prep_kernel(attrs_ref, att_g_ref, img_ref, img_w_ref, sem_w_t_ref, sem_b_t_ref,
                 att_outs_ref, img_proj_ref, semT_ref,
                 *, thresh, temperature, mxu_dtype):
    att_outs = _attribute_propagation(attrs_ref[...], att_g_ref[...],
                                      thresh, temperature)                # (C, D)
    att_outs_ref[...] = att_outs

    img_proj = jnp.dot(img_ref[...], img_w_ref[...],
                       preferred_element_type=jnp.float32)                # (B, H)
    # semT[h, c] = sum_d sem_w[d, h] * att_outs[c, d]   (sem_w_t is (H, D))
    semT = lax.dot_general(sem_w_t_ref[...], att_outs.astype(mxu_dtype),
                           (((1,), (1,)), ((), ())),
                           preferred_element_type=jnp.float32) + sem_b_t_ref[...]

    B, H = img_proj.shape
    C = semT.shape[1]
    Bp, Hp = img_proj_ref.shape
    _, Cp = semT_ref.shape

    if (Bp, Hp) != (B, H):
        img_proj_ref[...] = jnp.zeros_like(img_proj_ref)
    img_proj_ref[:B, :H] = img_proj

    if (Hp, Cp) != (H, C):
        semT_ref[...] = jnp.zeros_like(semT_ref)
    semT_ref[:H, :C] = semT


# ----------------------------------------------------------------------------
# Tiled path, stage 2: relation head over a (B-tiles, C-tiles, H-chunks) grid.
#   out[b, c] = sum_h relu(img_proj[b, h] + sem_projT[h, c]) * fc_w[h] + fc_b
# The (tb, tc) output block is the f32 accumulator (revisited across the
# "arbitrary" H axis); each step statically unrolls one 128-wide H chunk.
# No rank-3 intermediate, no lane reduce, no relayout; fc_w/fc_b from SMEM.
# ----------------------------------------------------------------------------
def _relation_tile_kernel(ip_ref, spT_ref, fcw_ref, fcb_ref, out_ref, *, block_h):
    kk = pl.program_id(2)

    @pl.when(kk == 0)
    def _():
        out_ref[...] = jnp.zeros_like(out_ref)

    ip = ip_ref[...]                       # (tb, block_h) f32
    spT = spT_ref[...]                     # (block_h, tc) f32
    acc = out_ref[...]                     # (tb, tc) f32 accumulator
    base = kk * block_h
    for hh in range(block_h):              # static unroll: pure VPU per step
        z = jnp.maximum(ip[:, hh:hh + 1] + spT[hh:hh + 1, :], 0.0)   # (tb, tc)
        acc = acc + z * fcw_ref[base + hh]                            # SMEM scalar
    bias = jnp.where(kk == pl.num_programs(2) - 1, fcb_ref[0, 0], 0.0)
    out_ref[...] = acc + bias


# ----------------------------------------------------------------------------
# Module wrapper
# ----------------------------------------------------------------------------
def ppn_relation_net_forward(image_feats, attributes, params, *, T, degree,
                             mxu_dtype=jnp.float32, tiled=None,
                             block_b=32, block_c=256, block_h=128):
    thresh = float(math.cos(math.pi * degree / 180.0))
    temperature = float(T)
    B, Di = image_feats.shape
    C, D = attributes.shape
    H = params["img_w"].shape[1]
    Ha = params["att_g"].shape[1]

    # One-time wrapper-side casts / transposes of small-ish operands (halves
    # weight DMA when mxu_dtype=bf16; attention path stays f32).
    img_c = image_feats.astype(mxu_dtype)
    img_w_c = params["img_w"].astype(mxu_dtype)          # (Di, H)
    sem_w_t_c = params["sem_w"].T.astype(mxu_dtype)      # (H, Di)
    sem_b = params["sem_b"].astype(jnp.float32)          # (1, H)
    fc_w = params["fc_w"].astype(jnp.float32)            # (1, H)
    fc_b = params["fc_b"].astype(jnp.float32)            # (1, 1)

    if tiled is None:
        # Crossover lowered per perf review: the fused kernel materialises the
        # whole (B, C, H) hidden tensor, so only use it when that is ~vreg-sized.
        tiled = (B * C * H * 4) > (256 << 10)

    if not tiled:
        out, att_outs = pl.pallas_call(
            partial(_fused_kernel, thresh=thresh, temperature=temperature,
                    mxu_dtype=mxu_dtype),
            out_shape=(jax.ShapeDtypeStruct((B, C), jnp.float32),
                       jax.ShapeDtypeStruct((C, D), jnp.float32)),
            in_specs=[_vmem_spec()] * 7 + [_smem_spec()],
            out_specs=(_vmem_spec(), _vmem_spec()),
        )(attributes, params["att_g"], img_c, img_w_c, sem_w_t_c, sem_b,
          fc_w, fc_b)
        return out, att_outs

    # ---- tiled path -------------------------------------------------------
    th = block_h
    assert th % 128 == 0, "block_h must be a multiple of 128 (lane tiling)"
    tb = min(block_b, _round_up(B, 8))
    tc = min(block_c, _round_up(C, 128))
    Bp, Cp, Hp = _round_up(B, tb), _round_up(C, tc), _round_up(H, th)
    # Megacore nudge: keep >= 2 grid steps along a parallel axis when possible.
    if Bp // tb == 1 and Cp // tc == 1 and Cp >= 256:
        tc = 128
        Cp = _round_up(C, tc)

    itemsize = jnp.dtype(mxu_dtype).itemsize
    prep_bytes = ((C * D + D * Ha) * 4 +                     # attrs, att_g
                  (B * Di + Di * H + H * Di) * itemsize +    # img, img_w, sem_w_t
                  H * 4 +                                    # sem_b_t
                  (C * D + Bp * Hp + Hp * Cp) * 4 +          # outputs
                  (3 * C * C + C * Ha + H * C + B * H) * 4)  # intermediates
    prep_vmem = int(min(max(2 * prep_bytes + (8 << 20), 32 << 20), 96 << 20))

    sem_b_t = sem_b.T                                        # (H, 1)
    att_outs, img_proj_p, semT_p = pl.pallas_call(
        partial(_prep_kernel, thresh=thresh, temperature=temperature,
                mxu_dtype=mxu_dtype),
        out_shape=(jax.ShapeDtypeStruct((C, D), jnp.float32),
                   jax.ShapeDtypeStruct((Bp, Hp), jnp.float32),
                   jax.ShapeDtypeStruct((Hp, Cp), jnp.float32)),
        in_specs=[_vmem_spec()] * 6,
        out_specs=(_vmem_spec(), _vmem_spec(), _vmem_spec()),
        compiler_params=pltpu.CompilerParams(vmem_limit_bytes=prep_vmem),
    )(attributes, params["att_g"], img_c, img_w_c, sem_w_t_c, sem_b_t)

    fcw_flat = jnp.pad(fc_w[0], (0, Hp - H))                 # (Hp,) zero-padded

    stage2_vmem = int(max(2 * (tb * th + th * tc + tb * tc) * 4 + (2 << 20),
                          8 << 20))
    out_padded = pl.pallas_call(
        partial(_relation_tile_kernel, block_h=th),
        out_shape=jax.ShapeDtypeStruct((Bp, Cp), jnp.float32),
        grid=(Bp // tb, Cp // tc, Hp // th),
        in_specs=[
            pl.BlockSpec((tb, th), lambda i, j, k: (i, k)),   # img_proj_p
            pl.BlockSpec((th, tc), lambda i, j, k: (k, j)),   # sem_projT_p
            _smem_spec(),                                     # fc_w (Hp,)
            _smem_spec(),                                     # fc_b (1, 1)
        ],
        out_specs=pl.BlockSpec((tb, tc), lambda i, j, k: (i, j)),
        compiler_params=pltpu.CompilerParams(
            dimension_semantics=("parallel", "parallel", "arbitrary"),
            vmem_limit_bytes=stage2_vmem),
    )(img_proj_p, semT_p, fcw_flat, fc_b)

    return out_padded[:B, :C], att_outs


def init_params(key, att_dim, image_dim, att_hC, hidden_C):
    keys = jax.random.split(key, 6)

    def unif(k, shape, fan_in):
        bound = 1.0 / math.sqrt(fan_in)  # matches kaiming_uniform(a=sqrt(5))
        return jax.random.uniform(k, shape, jnp.float32, -bound, bound)

    return {
        "att_g": unif(keys[0], (att_dim, att_hC), att_hC),
        "img_w": unif(keys[1], (image_dim, hidden_C), hidden_C),
        "sem_w": unif(keys[2], (image_dim, hidden_C), hidden_C),
        "sem_b": unif(keys[3], (1, hidden_C), hidden_C),
        # nn.Linear(hidden_C, 1): weight (1, hidden_C), bias (1, 1)
        "fc_w": unif(keys[4], (1, hidden_C), hidden_C),
        "fc_b": unif(keys[5], (1, 1), hidden_C),
    }


# Pure-JAX reference for correctness checks (mirrors the kernel's MXU dtype).
def _reference(image_feats, attributes, params, *, T, degree, mxu_dtype=jnp.float32):
    thresh = math.cos(math.pi * degree / 180.0)
    g = jnp.dot(attributes, params["att_g"], preferred_element_type=jnp.float32)
    gn = g * lax.rsqrt(jnp.sum(g * g, axis=-1, keepdims=True) + 1e-12)
    sims = jnp.dot(gn, gn.T, preferred_element_type=jnp.float32)
    raw = jnp.where(sims > thresh, sims, jnp.full_like(sims, -9.0e15)) * T
    attn = jax.nn.softmax(raw, axis=1)
    att_outs = jnp.dot(attn, attributes, preferred_element_type=jnp.float32)

    cast = lambda x: x.astype(mxu_dtype)
    img_proj = jnp.dot(cast(image_feats), cast(params["img_w"]),
                       preferred_element_type=jnp.float32)
    sem_proj = jnp.dot(cast(att_outs), cast(params["sem_w"]),
                       preferred_element_type=jnp.float32) + params["sem_b"]
    hidden = jax.nn.relu(img_proj[:, None, :] + sem_proj[None, :, :])
    out = jnp.einsum("bch,h->bc", hidden, params["fc_w"][0]) + params["fc_b"][0, 0]
    return out, att_outs


if __name__ == "__main__":
    # ---- Test 1: small demo shapes -> fused single-kernel path (f32 MXU) ----
    att_dim = image_dim = 32
    att_hC, hidden_C = 16, 32
    cls_num, batch = 8, 4
    T, degree = 5.0, 75

    key = jax.random.PRNGKey(0)
    k_param, k_img, k_att = jax.random.split(key, 3)
    params = init_params(k_param, att_dim, image_dim, att_hC, hidden_C)
    image_feats = jax.random.normal(k_img, (batch, image_dim), jnp.float32)
    attributes = jax.random.normal(k_att, (cls_num, att_dim), jnp.float32)

    out, att_outs = ppn_relation_net_forward(
        image_feats, attributes, params, T=T, degree=degree, tiled=False)
    out = jax.block_until_ready(out)
    att_outs = jax.block_until_ready(att_outs)

    ref_out, ref_att = _reference(image_feats, attributes, params, T=T, degree=degree)
    assert out.shape == (batch, cls_num)
    assert att_outs.shape == (cls_num, att_dim)
    assert jnp.allclose(att_outs, ref_att, rtol=5e-3, atol=5e-3)
    assert jnp.allclose(out, ref_out, rtol=5e-3, atol=5e-3)

    # ---- Test 2: larger (still quick) shapes -> tiled + bf16-MXU path -------
    att_dim2 = image_dim2 = 128
    att_hC2, hidden_C2 = 64, 256
    cls_num2, batch2 = 200, 20      # deliberately not tile-aligned
    T2, degree2 = 5.0, 25

    k_param2, k_img2, k_att2 = jax.random.split(jax.random.PRNGKey(1), 3)
    params2 = init_params(k_param2, att_dim2, image_dim2, att_hC2, hidden_C2)
    image_feats2 = jax.random.normal(k_img2, (batch2, image_dim2), jnp.float32)
    attributes2 = jax.random.normal(k_att2, (cls_num2, att_dim2), jnp.float32)

    out2, att_outs2 = ppn_relation_net_forward(
        image_feats2, attributes2, params2, T=T2, degree=degree2,
        mxu_dtype=jnp.bfloat16, tiled=True)
    out2 = jax.block_until_ready(out2)
    att_outs2 = jax.block_until_ready(att_outs2)

    ref_out2, ref_att2 = _reference(image_feats2, attributes2, params2,
                                    T=T2, degree=degree2, mxu_dtype=jnp.bfloat16)
    assert out2.shape == (batch2, cls_num2)
    assert att_outs2.shape == (cls_num2, att_dim2)
    assert jnp.allclose(att_outs2, ref_att2, rtol=5e-3, atol=5e-3)
    assert jnp.allclose(out2, ref_out2, rtol=2e-2, atol=2e-2)   # bf16 MXU operands

    print("KERNEL_OK")
</pallas_src>

<mosaic_0001>
module attributes {stable_mosaic.version = 11 : i64} {
  func.func @_fused_kernel(%arg0: memref<8x32xf32, #tpu.memory_space<vmem>>, %arg1: memref<32x16xf32, #tpu.memory_space<vmem>>, %arg2: memref<4x32xf32, #tpu.memory_space<vmem>>, %arg3: memref<32x32xf32, #tpu.memory_space<vmem>>, %arg4: memref<32x32xf32, #tpu.memory_space<vmem>>, %arg5: memref<1x32xf32, #tpu.memory_space<vmem>>, %arg6: memref<1x32xf32, #tpu.memory_space<vmem>>, %arg7: memref<1x1xf32, #tpu.memory_space<smem>>, %arg8: memref<4x8xf32, #tpu.memory_space<vmem>>, %arg9: memref<8x32xf32, #tpu.memory_space<vmem>>) attributes {dimension_semantics = [], scalar_prefetch = 0 : i64, scratch_operands = 0 : i64, tpu.core_type = #tpu.core_type<tc>} {
    %c0 = arith.constant 0 : index
    %c0_0 = arith.constant 0 : index
    %0 = vector.load %arg0[%c0, %c0_0] : memref<8x32xf32, #tpu.memory_space<vmem>>, vector<8x32xf32>
    %c0_1 = arith.constant 0 : index
    %c0_2 = arith.constant 0 : index
    %1 = vector.load %arg1[%c0_1, %c0_2] : memref<32x16xf32, #tpu.memory_space<vmem>>, vector<32x16xf32>
    %cst = arith.constant dense<0.000000e+00> : vector<8x16xf32>
    %2 = tpu.matmul %0, %1, %cst {dimension_numbers = #tpu.dot_dimension_numbers<[1], [0], [0], [1], [0, 0, 1, 1], [], []>} : vector<8x32xf32>, vector<32x16xf32>, vector<8x16xf32> -> vector<8x16xf32>
    %3 = arith.mulf %2, %2 : vector<8x16xf32>
    %cst_3 = arith.constant dense<0.000000e+00> : vector<8xf32>
    %4 = vector.multi_reduction <add>, %3, %cst_3 [1] : vector<8x16xf32> to vector<8xf32>
    %5 = vector.shape_cast %4 : vector<8xf32> to vector<8x1xf32>
    %cst_4 = arith.constant 9.99999996E-13 : f32
    %6 = vector.broadcast %cst_4 : f32 to vector<8x1xf32>
    %7 = arith.addf %5, %6 : vector<8x1xf32>
    %8 = math.rsqrt %7 : vector<8x1xf32>
    %9 = vector.broadcast %8 : vector<8x1xf32> to vector<8x16xf32>
    %10 = arith.mulf %2, %9 : vector<8x16xf32>
    %cst_5 = arith.constant dense<0.000000e+00> : vector<8x8xf32>
    %11 = tpu.matmul %10, %10, %cst_5 {dimension_numbers = #tpu.dot_dimension_numbers<[1], [1], [0], [0], [0, 0, 1, 0], [], []>} : vector<8x16xf32>, vector<8x16xf32>, vector<8x8xf32> -> vector<8x8xf32>
    %cst_6 = arith.constant 0.258819044 : f32
    %12 = vector.broadcast %cst_6 : f32 to vector<8x8xf32>
    %13 = arith.cmpf ogt, %11, %12 : vector<8x8xf32>
    %cst_7 = arith.constant -9.000000e+15 : f32
    %14 = vector.broadcast %cst_7 : f32 to vector<8x8xf32>
    %15 = arith.select %13, %11, %14 : vector<8x8xi1>, vector<8x8xf32>
    %cst_8 = arith.constant 5.000000e+00 : f32
    %16 = vector.broadcast %cst_8 : f32 to vector<8x8xf32>
    %17 = arith.mulf %15, %16 : vector<8x8xf32>
    %cst_9 = arith.constant dense<0xFF800000> : vector<8xf32>
    %18 = vector.multi_reduction <maximumf>, %17, %cst_9 [1] : vector<8x8xf32> to vector<8xf32>
    %19 = vector.shape_cast %18 : vector<8xf32> to vector<8x1xf32>
    %20 = vector.broadcast %19 : vector<8x1xf32> to vector<8x8xf32>
    %21 = arith.subf %17, %20 : vector<8x8xf32>
    %22 = math.exp %21 : vector<8x8xf32>
    %cst_10 = arith.constant dense<0.000000e+00> : vector<8xf32>
    %23 = vector.multi_reduction <add>, %22, %cst_10 [1] : vector<8x8xf32> to vector<8xf32>
    %24 = vector.shape_cast %23 : vector<8xf32> to vector<8x1xf32>
    %25 = vector.broadcast %24 : vector<8x1xf32> to vector<8x8xf32>
    %26 = arith.divf %22, %25 : vector<8x8xf32>
    %cst_11 = arith.constant dense<0.000000e+00> : vector<8x32xf32>
    %27 = tpu.matmul %26, %0, %cst_11 {dimension_numbers = #tpu.dot_dimension_numbers<[1], [0], [0], [1], [0, 0, 1, 1], [], []>} : vector<8x8xf32>, vector<8x32xf32>, vector<8x32xf32> -> vector<8x32xf32>
    %c0_12 = arith.constant 0 : index
    %c0_13 = arith.constant 0 : index
    %28 = vector.load %arg9[%c0_12, %c0_13] : memref<8x32xf32, #tpu.memory_space<vmem>>, vector<8x32xf32>
    tpu.vector_store %arg9[%c0_12, %c0_13], %27 {strides = array<i32>} : memref<8x32xf32, #tpu.memory_space<vmem>>, vector<8x32xf32>,
    %c0_14 = arith.constant 0 : index
    %c0_15 = arith.constant 0 : index
    %29 = vector.load %arg2[%c0_14, %c0_15] : memref<4x32xf32, #tpu.memory_space<vmem>>, vector<4x32xf32>
    %c0_16 = arith.constant 0 : index
    %c0_17 = arith.constant 0 : index
    %30 = vector.load %arg3[%c0_16, %c0_17] : memref<32x32xf32, #tpu.memory_space<vmem>>, vector<32x32xf32>
    %cst_18 = arith.constant dense<0.000000e+00> : vector<4x32xf32>
    %31 = tpu.matmul %29, %30, %cst_18 {dimension_numbers = #tpu.dot_dimension_numbers<[1], [0], [0], [1], [0, 0, 1, 1], [], []>} : vector<4x32xf32>, vector<32x32xf32>, vector<4x32xf32> -> vector<4x32xf32>
    %c0_19 = arith.constant 0 : index
    %c0_20 = arith.constant 0 : index
    %32 = vector.load %arg4[%c0_19, %c0_20] : memref<32x32xf32, #tpu.memory_space<vmem>>, vector<32x32xf32>
    %cst_21 = arith.constant dense<0.000000e+00> : vector<8x32xf32>
    %33 = tpu.matmul %27, %32, %cst_21 {dimension_numbers = #tpu.dot_dimension_numbers<[1], [1], [0], [0], [0, 0, 1, 0], [], []>} : vector<8x32xf32>, vector<32x32xf32>, vector<8x32xf32> -> vector<8x32xf32>
    %c0_22 = arith.constant 0 : index
    %c0_23 = arith.constant 0 : index
    %34 = vector.load %arg5[%c0_22, %c0_23] : memref<1x32xf32, #tpu.memory_space<vmem>>, vector<1x32xf32>
    %35 = vector.broadcast %34 : vector<1x32xf32> to vector<8x32xf32>
    %36 = arith.addf %33, %35 : vector<8x32xf32>
    %37 = vector.shape_cast %31 : vector<4x32xf32> to vector<4x1x32xf32>
    %38 = vector.shape_cast %36 : vector<8x32xf32> to vector<1x8x32xf32>
    %39 = vector.broadcast %37 : vector<4x1x32xf32> to vector<4x8x32xf32>
    %40 = vector.broadcast %38 : vector<1x8x32xf32> to vector<4x8x32xf32>
    %41 = arith.addf %39, %40 : vector<4x8x32xf32>
    %cst_24 = arith.constant 0.000000e+00 : f32
    %42 = vector.broadcast %cst_24 : f32 to vector<4x8x32xf32>
    %43 = arith.maximumf %41, %42 : vector<4x8x32xf32>
    %c0_25 = arith.constant 0 : index
    %c0_26 = arith.constant 0 : index
    %44 = vector.load %arg6[%c0_25, %c0_26] : memref<1x32xf32, #tpu.memory_space<vmem>>, vector<1x32xf32>
    %45 = vector.shape_cast %44 : vector<1x32xf32> to vector<1x1x32xf32>
    %46 = vector.broadcast %45 : vector<1x1x32xf32> to vector<4x8x32xf32>
    %47 = arith.mulf %43, %46 : vector<4x8x32xf32>
    %cst_27 = arith.constant dense<0.000000e+00> : vector<4x8xf32>
    %48 = vector.multi_reduction <add>, %47, %cst_27 [2] : vector<4x8x32xf32> to vector<4x8xf32>
    %c0_28 = arith.constant 0 : index
    %c0_29 = arith.constant 0 : index
    %49 = memref.load %arg7[%c0_28, %c0_29] : memref<1x1xf32, #tpu.memory_space<smem>>
    %50 = vector.broadcast %49 : f32 to vector<4x8xf32>
    %51 = arith.addf %48, %50 : vector<4x8xf32>
    %c0_30 = arith.constant 0 : index
    %c0_31 = arith.constant 0 : index
    %52 = vector.load %arg8[%c0_30, %c0_31] : memref<4x8xf32, #tpu.memory_space<vmem>>, vector<4x8xf32>
    tpu.vector_store %arg8[%c0_30, %c0_31], %51 {strides = array<i32>} : memref<4x8xf32, #tpu.memory_space<vmem>>, vector<4x8xf32>,
    return
  }
}

</mosaic_0001>

<bundles_post_ra>
// kernel: tpu_custom_call.1
= control target key start
LH: loop header
LB: loop body
LE: loop exit
PB: predicated region body
PF: predicated region fallthrough
CT: control target
= control target key end

     0   :  { %16 = vsyncpa [#allocation4], 0  ;;  %s562_s0 = inlined_call_operand.vmem [shape: f32[8,32], index: 0, kind: input, shape index: {}]   ;;  %s563_s1 = inlined_call_operand.vmem [shape: f32[32,16], index: 1, kind: input, shape index: {}]   ;;  %s564_s2 = inlined_call_operand.vmem [shape: f32[4,32], index: 2, kind: input, shape index: {}]   ;;  %s565_s3 = inlined_call_operand.vmem [shape: f32[32,32], index: 3, kind: input, shape index: {}]   ;;  %s566_s4 = inlined_call_operand.hbm [shape: f32[32,32], index: 4, kind: input, shape index: {}]   ;;  %s567_s5 = inlined_call_operand.vmem [shape: f32[1,32], index: 5, kind: input, shape index: {}]   ;;  %s568_s6 = inlined_call_operand.vmem [shape: f32[1,32], index: 6, kind: input, shape index: {}]   ;;  %s569_s7 = inlined_call_operand.<no memory space> [shape: f32[1,1], index: 7, kind: input, shape index: {}]   ;;  %s570_s8 = inlined_call_operand.hbm [shape: f32[4,8], index: 8, kind: output, shape index: {0}]   ;;  %s571_s9 = inlined_call_operand.hbm [shape: f32[8,32], index: 9, kind: output, shape index: {1}]  }
   0x1   :  { %17 = vsyncpa [#allocation5], 0 }
   0x2   :  { %18 = vsyncpa [#allocation8], 0  ;;  %s31_s11 = sshll.u32 %s566_s4, 4  ;;  %s441_s12 = smov [#allocation3]   ;;  %s32_s11 = int_to_ptr.hbm [resolvable:$true] %s31_s11 }
   0x3   :  { %s33_s13 = sshll.u32 %s441_s12, 4  ;;  %s442_s14 = smov 128   ;;  %s34_s13 = int_to_ptr.vmem [resolvable:$true] %s33_s13 }
   0x4   :  { %s443_s15 = smov 8  }
   0x5   :  { %39 = dma.hbm_to_vmem [thread:$0]  %s32_s11, 512, %s34_s13, [#allocation4], %s442_s14, %s442_s14, %s443_s15  }
   0x6   :  { %435 = dma.done.wait [#allocation4], 512  }
   0x7   :  { %436 = vsyncadd [#allocation4], 4294966784  ;;  %v54_v0 = vld [vmem:[%s563_s1 + $0x18] sm:$0xff]  ;;  %v53_v1 = vld [vmem:[%s563_s1 + $0x10] sm:$0xff]  ;;  %vm55_vm0 = vcmask 261120   ;;  %vm80_vm1 = vcmask 130048  }
   0x8   :  { %71 = vmatpush.msra.mxu0 %v54_v0  ;;  %v52_v2 = vld [vmem:[%s563_s1 + $0x8] sm:$0xff]  ;;  %v51_v3 = vld [vmem:[%s563_s1] sm:$0xff]  ;;  %vm122_vm6 = vcmask 64512   ;;  %v202_v27 = vld [vmem:[#allocation3 + $0x18] sm:$0xff]  ;;  %s325_s16 = sshll.u32 %s571_s9, 4  ;;  %vm298_vm11 = vcmask 1041409   ;;  %s326_s16 = int_to_ptr.hbm [resolvable:$true] %s325_s16 }
   0x9   :  { %v50_v4 = vld [vmem:[%s562_s0] sm:$0xff]  ;;  %v175_v28 = vld [vmem:[%s565_s3 + $0x18] sm:$0xff]  ;;  %345 = vmatpush.xpose.msk.msra.mxu2 %vm55_vm0, %v202_v27  ;;  %v174_v29 = vld [vmem:[%s565_s3 + $0x10] sm:$0xff]  ;;  %vm300_vm12 = vcmask 1042434   ;;  %s445_s9 = smov [#allocation6]   ;;  %s314_s21 = sshll.u32 %s570_s8, 4  ;;  %s315_s21 = int_to_ptr.hbm [resolvable:$true] %s314_s21 }
   0xa   :  { %72 = vmatpush.msra.mxu0 %v53_v1  ;;  %191 = vmatpush.msra.mxu3 %v175_v28  ;;  %v201_v30 = vld [vmem:[#allocation3 + $0x10] sm:$0xff]  ;;  %v173_v31 = vld [vmem:[%s565_s3 + $0x8] sm:$0xff]  ;;  %v172_v32 = vld [vmem:[%s565_s3] sm:$0xff]  ;;  %s312_s19 = sshll.u32 %s445_s9, 4  ;;  %vm302_vm13 = vcmask 1043459   ;;  %vm305_vm14 = vcmask 60416   ;;  %s313_s19 = int_to_ptr.vmem [resolvable:$true] %s312_s19 }
   0xb   :  { %v171_v33 = vld [vmem:[%s564_s2] sm:$0xf]  ;;  %v200_v34 = vld [vmem:[#allocation3 + $0x8] sm:$0xff] }
   0xc   :  { %73 = vmatpush.msra.mxu0 %v52_v2  ;;  %192 = vmatpush.msra.mxu3 %v174_v29  ;;  %v199_v35 = vld [vmem:[#allocation3] sm:$0xff] }
   0xd   :  { %346 = vmatpush.xpose.msk.msra.mxu2 %vm55_vm0, %v201_v30  ;;  %v355_v53 = vld [vmem:[%s567_s5] ss:$0 sm:$0xff]  ;;  %s444_s5 = smov [#allocation7]  }
   0xe   :  { %74 = vmatpush.msra.mxu0 %v51_v3  ;;  %193 = vmatpush.msra.mxu3 %v173_v31  ;;  %v356_v61 = vld [vmem:[%s568_s6] ss:$0 sm:$0xff]  ;;  %s323_s6 = sshll.u32 %s444_s5, 4  ;;  %s324_s6 = int_to_ptr.vmem [resolvable:$true] %s323_s6 }
   0xf   :  { %340 = vmatmul.msk.f32.vlgmr.msra.gmra.mxu0 %vm55_vm0, %v50_v4 }
  0x10   :  { %194 = vmatpush.msra.mxu3 %v172_v32 }
  0x11   :  { %344 = vmatmul.msk.f32.vlgmr.msra.gmra.mxu3 %vm55_vm0, %v171_v33  ;;  %347 = vmatpush.xpose.msk.msra.mxu2 %vm55_vm0, %v200_v34 }
  0x15   :  { %348 = vmatpush.xpose.msk.msra.mxu2 %vm55_vm0, %v199_v35 }
  0x8c   :  { %v76_v5 = vpop.f32.mrf.mxu0 }
  0x8d   :  { %v79_v6 = vmul.f32 %v76_v5, %v76_v5 }
  0x8f   :  { %v81_v7 = vsel %vm80_vm1, %v79_v6, 0.0 }
  0x90   :  { %82 = vadd.xlane.f32.xlu0 %v81_v7 }
  0x94   :  { %v196_v49 = vpop.f32.mrf.mxu3 }
  0x95   :  { %v243_v50 = vrot.slane %v196_v49, 1  ;;  %v245_v51 = vrot.slane %v196_v49, 3  ;;  %v244_v52 = vrot.slane %v196_v49, 2  ;;  %v246_v57 = vperm.slane %v196_v49, 0 }
  0x97   :  { %v247_v54 = vperm.slane %v243_v50, 0  ;;  %v249_v55 = vperm.slane %v245_v51, 0  ;;  %v248_v58 = vperm.slane %v244_v52, 0 }
 0x103   :  { %v83_v8 = vpop.xlane.xlu0 %82 }
 0x104   :  { %v84_v9 = vadd.f32 1e-12, %v83_v8 }
 0x106   :  { %357 = vrsqrt.f32 %v84_v9  ;;  %vm91_vm3 = vweird.f32 %v84_v9 }
 0x10c   :  { %v358_v10 = vpop.eup %357 }
 0x10d   :  { %v86_v11 = vmul.f32 %v358_v10, %v84_v9  ;;  %vm92_vm2 = vweird.f32 %v358_v10 }
 0x10e   :  { %vm93_vm4 = vmor %vm91_vm3, %vm92_vm2 }
 0x10f   :  { %v87_v12 = vmul.f32 %v358_v10, %v86_v11 }
 0x111   :  { %v88_v13 = vmul.f32 0.5, %v87_v12 }
 0x113   :  { %v89_v14 = vsub.f32 1.5, %v88_v13  ;;  %v292_v13 = vlaneseq }
 0x115   :  { %v90_v15 = vmul.f32 %v358_v10, %v89_v14 }
 0x117   :  { %v94_v16 = vsel %vm93_vm4, %v358_v10, %v90_v15  ;;  %v283_v15 = vstv %s569_s7 }
 0x118   :  { %v95_v17 = vmul.f32 %v94_v16, %v76_v5 }
 0x11a   :  { %341 = vmatpush.xpose.msk.msra.mxu1 %vm80_vm1, %v95_v17 }
 0x11d   :  { %342 = vmatmul.msk.f32.vlgmr.msra.gmra.mxu1 %vm80_vm1, %v95_v17  ;;  %v293_v17 = vand.u32 127, %v292_v13 }
 0x11e   :  { %165 = vmatpush.msrb.mxu1 %v50_v4 }
 0x19a   :  { %v116_v18 = vpop.f32.mrf.mxu1 }
 0x19b   :  { %vm119_vm5 = vcmp.gt.f32.partialorder %v116_v18, 0.25881904 }
 0x19c   :  { %v120_v19 = vsel %vm119_vm5, %v116_v18, -9e+15 }
 0x19d   :  { %v121_v20 = vmul.f32 5.0, %v120_v19 }
 0x19f   :  { %v123_v21 = vsel %vm122_vm6, %v121_v20, -inf }
 0x1a0   :  { %124 = vmax.xlane.f32.xlu0 %v123_v21 }
 0x213   :  { %v125_v22 = vpop.xlane.xlu0 %124 }
 0x214   :  { %v126_v23 = vsub.f32 %v121_v20, %v125_v22 }
 0x216   :  { %v127_v24 = vmul.f32 1.442695, %v126_v23 }
 0x218   :  { %359 = vpow2.f32 %v127_v24 }
 0x21e   :  { %v360_v25 = vpop.eup %359 }
 0x21f   :  { %v129_v26 = vsel %vm122_vm6, %v360_v25, 0.0 }
 0x220   :  { %130 = vadd.xlane.f32.xlu1 %v129_v26 }
 0x293   :  { %v131_v36 = vpop.xlane.xlu1 %130 }
 0x294   :  { %361 = vrcp.f32 %v131_v36  ;;  %v143_v40 = vand.u32 2147483648, %v131_v36  ;;  %v141_v42 = vand.u32 2147483647, %v131_v36  ;;  %vm137_vm8 = vweird.f32 %v131_v36 }
 0x296   :  { %v144_v44 = vor.u32 1.1754944e-38, %v143_v40  ;;  %vm142_vm10 = vcmp.eq.f32.partialorder %v141_v42, 8.507059e+37 }
 0x29a   :  { %v362_v37 = vpop.eup %361 }
 0x29b   :  { %v133_v38 = vmul.f32 %v362_v37, %v131_v36  ;;  %vm138_vm7 = vweird.f32 %v362_v37 }
 0x29c   :  { %vm139_vm9 = vmor %vm137_vm8, %vm138_vm7 }
 0x29d   :  { %v134_v39 = vsub.f32 1.0, %v133_v38 }
 0x29f   :  { %v135_v41 = vmul.f32 %v362_v37, %v134_v39 }
 0x2a1   :  { %v136_v43 = vadd.f32 %v362_v37, %v135_v41 }
 0x2a3   :  { %v140_v45 = vsel %vm139_vm9, %v362_v37, %v136_v43 }
 0x2a4   :  { %v145_v46 = vsel %vm142_vm10, %v144_v44, %v140_v45 }
 0x2a5   :  { %v146_v47 = vmul.f32 %v360_v25, %v145_v46 }
 0x2a7   :  { %343 = vmatmul.msk.f32.vlgmr.msrb.gmra.mxu1 %vm122_vm6, %v146_v47 }
 0x324   :  { %v167_v48 = vpop.f32.mrf.mxu1 }
 0x325   :  { %170 = vst.msk [vmem:[#allocation7] sm:$0xff] %vm55_vm0, %v167_v48  ;;  %349 = vmatmul.msk.f32.vlgmr.msra.gmra.mxu2 %vm55_vm0, %v167_v48 }
 0x326   :  { %328 = dma.vmem_to_hbm [thread:$0]  %s324_s6, 128, %s326_s16, [#allocation8]  }
 0x3a8   :  { %v239_v56 = vpop.f32.mrf.mxu2 }
 0x3a9   :  { %v240_v59 = vadd.f32 %v355_v53, %v239_v56 }
 0x3ab   :  { %v257_v60 = vadd.f32 %v249_v55, %v240_v59  ;;  %v255_v62 = vadd.f32 %v247_v54, %v240_v59  ;;  %v254_v63 = vadd.f32 %v246_v57, %v240_v59  ;;  %v256_v3 = vadd.f32 %v248_v58, %v240_v59 }
 0x3ad   :  { %v261_v0 = vmax.f32 %v257_v60, 0.0  ;;  %v259_v1 = vmax.f32 %v255_v62, 0.0  ;;  %v258_v2 = vmax.f32 %v254_v63, 0.0  ;;  %v260_v10 = vmax.f32 %v256_v3, 0.0 }
 0x3af   :  { %v269_v4 = vmul.f32 %v356_v61, %v261_v0  ;;  %v267_v5 = vmul.f32 %v356_v61, %v259_v1  ;;  %v266_v6 = vmul.f32 %v356_v61, %v258_v2  ;;  %v268_v11 = vmul.f32 %v356_v61, %v260_v10 }
 0x3b1   :  { %v279_v7 = vsel %vm55_vm0, %v269_v4, 0.0  ;;  %v273_v8 = vsel %vm55_vm0, %v267_v5, 0.0  ;;  %v270_v9 = vsel %vm55_vm0, %v266_v6, 0.0  ;;  %v276_v12 = vsel %vm55_vm0, %v268_v11, 0.0 }
 0x3b2   :  { %280 = vadd.xlane.f32.xlu0 %v279_v7  ;;  %274 = vadd.xlane.f32.xlu2 %v273_v8 }
 0x3b3   :  { %271 = vadd.xlane.f32.xlu1 %v270_v9 }
 0x3ba   :  { %277 = vadd.xlane.f32.xlu2 %v276_v12 }
 0x425   :  { %v275_v14 = vpop.xlane.xlu2 %274  ;;  %v281_v20 = vpop.xlane.xlu0 %280 }
 0x426   :  { %v272_v16 = vpop.xlane.xlu1 %271  ;;  %v285_v18 = vadd.f32 %v283_v15, %v275_v14  ;;  %v287_v21 = vadd.f32 %v283_v15, %v281_v20 }
 0x427   :  { %v284_v19 = vadd.f32 %v283_v15, %v272_v16 }
 0x428   :  { %v295_v22 = vperm.slane %v285_v18, %v293_v17  ;;  %v297_v27 = vperm.slane %v287_v21, %v293_v17 }
 0x429   :  { %v294_v23 = vperm.slane %v284_v19, %v293_v17 }
 0x42b   :  { %v299_v28 = vsel %vm298_vm11, %v295_v22, %v294_v23 }
 0x42d   :  { %v278_v24 = vpop.xlane.xlu2 %277 }
 0x42e   :  { %v286_v25 = vadd.f32 %v283_v15, %v278_v24 }
 0x430   :  { %v296_v26 = vperm.slane %v286_v25, %v293_v17 }
 0x432   :  { %v301_v29 = vsel %vm300_vm12, %v296_v26, %v299_v28 }
 0x433   :  { %v303_v30 = vsel %vm302_vm13, %v297_v27, %v301_v29 }
 0x434   :  { %306 = vst.msk [vmem:[#allocation6] sm:$0xf] %vm305_vm14, %v303_v30 }
 0x435   :  { %317 = dma.vmem_to_hbm [thread:$0]  %s313_s19, 64, %s315_s21, [#allocation5]  }
 0x436   :  { %437 = dma.done.wait [#allocation5], 64  }
 0x437   :  { %438 = vsyncadd [#allocation5], 4294967232 }
 0x438   :  { %439 = dma.done.wait [#allocation8], 128  }
 0x439   :  { %440 = vsyncadd [#allocation8], 4294967168 }
 0x43a   :  { %337 = vsyncpa [#allocation4], 1 }
 0x43b   :  { %338 = vsyncpa [#allocation5], 1 }
 0x43c   :  { %339 = vsyncpa [#allocation8], 1 }

</bundles_post_ra>
